<compile_context>
chip_gen: v5e
topology: v5e:2x2
jax: 0.10.0
libtpu: 0.0.40
codegen_flags: <defaults>
</compile_context>

<pallas_src>
import jax
import jax.numpy as jnp
from jax.experimental import pallas as pl
from jax.experimental.pallas import tpu as pltpu


def conv_relu_kernel(x_ref, w_ref, o_ref):
    # x_ref: (H+2, W, 3*Cin)      kx-folded, spatially padded input (one batch elem)
    # w_ref: (3, 3*Cin, Cout_pad) folded weights (grid-invariant)
    # o_ref: (TILE_H, W, Cout_pad) lane-dense output row tile
    tile_h, W, cout_p = o_ref.shape
    K = x_ref.shape[-1]

    i = pl.program_id(1)
    row0 = pl.multiple_of(i * tile_h, tile_h)

    acc = jnp.zeros((tile_h * W, cout_p), jnp.float32)
    # 3 matmuls (one per ky); kx and Cin are already folded into K = 3*Cin.
    for ky in range(3):
        patch = x_ref[pl.ds(row0 + ky, tile_h), :, :].reshape(tile_h * W, K)
        acc += jnp.dot(patch, w_ref[ky], preferred_element_type=jnp.float32)

    out = jnp.maximum(acc, 0.0)  # ReLU (f32 on the VPU)
    o_ref[...] = out.reshape(tile_h, W, cout_p).astype(o_ref.dtype)


def conv_relu(x_nchw, w_oihw, *, tile_h=8):
    """ConvRelu forward. x_nchw: (N, Cin, H, W), w_oihw: (Cout, Cin, 3, 3)."""
    N, Cin, H, W = x_nchw.shape
    Cout = w_oihw.shape[0]
    assert w_oihw.shape == (Cout, Cin, 3, 3)
    if H % tile_h != 0:
        tile_h = H  # fall back to whole-image rows if H is not divisible
    n_h = H // tile_h

    cout_p = ((Cout + 127) // 128) * 128   # lane-dense output channels
    K = 3 * Cin                            # kx-folded contraction size

    # --- wrapper glue: NHWC, pad=1 halo, kx fold, weight fold/pad ---
    x = jnp.transpose(x_nchw, (0, 2, 3, 1))                     # (N, H, W, Cin)
    x = jnp.pad(x, ((0, 0), (1, 1), (1, 1), (0, 0)))            # (N, H+2, W+2, Cin)
    # channel index = kx*Cin + c  ->  (N, H+2, W, 3*Cin)
    x = jnp.concatenate([x[:, :, kx:kx + W, :] for kx in range(3)], axis=-1)

    # (Cout, Cin, 3, 3) -> (ky, kx, Cin, Cout) -> (3, 3*Cin, Cout) -> pad Cout
    w = jnp.transpose(w_oihw, (2, 3, 1, 0)).reshape(3, K, Cout)
    w = jnp.pad(w, ((0, 0), (0, 0), (0, cout_p - Cout)))

    out_nhwc = pl.pallas_call(
        conv_relu_kernel,
        out_shape=jax.ShapeDtypeStruct((N, H, W, cout_p), x_nchw.dtype),
        grid=(N, n_h),
        in_specs=[
            # folded padded image for batch n; invariant over the row-tile axis
            pl.BlockSpec((None, H + 2, W, K), lambda n, i: (n, 0, 0, 0)),
            # full folded weight, same block every step (resident)
            pl.BlockSpec((3, K, cout_p), lambda n, i: (0, 0, 0)),
        ],
        out_specs=pl.BlockSpec((None, tile_h, W, cout_p), lambda n, i: (n, i, 0, 0)),
        compiler_params=pltpu.CompilerParams(
            dimension_semantics=("parallel", "parallel")),
    )(x, w)

    # drop channel padding, back to NCHW (PyTorch layout)
    return jnp.transpose(out_nhwc[..., :Cout], (0, 3, 1, 2))


if __name__ == "__main__":
    # Small shapes consistent with ConvRelu(in_=4, out=8) on a (2, 4, 16, 16) input.
    N, Cin, Cout, H, W = 2, 4, 8, 16, 16

    key = jax.random.PRNGKey(0)
    kx_, kw_ = jax.random.split(key)
    x = jax.random.normal(kx_, (N, Cin, H, W), dtype=jnp.float32)
    # Matches nn.Conv2d(4, 8, 3, padding=1, bias=False) weight shape.
    w = jax.random.normal(kw_, (Cout, Cin, 3, 3), dtype=jnp.float32) * 0.1

    y = conv_relu(x, w)
    y = jax.block_until_ready(y)

    # Reference check against XLA conv + ReLU.
    ref = jax.lax.conv_general_dilated(
        x, w, window_strides=(1, 1), padding="SAME",
        dimension_numbers=("NCHW", "OIHW", "NCHW"),
        precision=jax.lax.Precision.HIGHEST)
    ref = jnp.maximum(ref, 0.0)
    assert y.shape == (N, Cout, H, W)
    assert jnp.allclose(y, ref, atol=2e-4, rtol=2e-4)

    print("KERNEL_OK")
</pallas_src>

<mosaic_0001>
module attributes {stable_mosaic.version = 11 : i64} {
  func.func @conv_relu_kernel(%arg0: i32, %arg1: i32, %arg2: memref<1x18x16x12xf32, #tpu.memory_space<vmem>>, %arg3: memref<3x12x128xf32, #tpu.memory_space<vmem>>, %arg4: memref<1x8x16x128xf32, #tpu.memory_space<vmem>>) attributes {dimension_semantics = [#tpu.dimension_semantics<parallel>, #tpu.dimension_semantics<parallel>], iteration_bounds = array<i64: 2, 2>, scalar_prefetch = 0 : i64, scratch_operands = 0 : i64, tpu.core_type = #tpu.core_type<tc>, window_params = [{transform_indices = @transform_0, window_bounds = array<i64: 1, 18, 16, 12>}, {pipeline_mode = #tpu.pipeline_mode<synchronous>, transform_indices = @transform_1, window_bounds = array<i64: 3, 12, 128>}, {transform_indices = @transform_2, window_bounds = array<i64: 1, 8, 16, 128>}]} {
    %c8_i32 = arith.constant 8 : i32
    %0 = arith.muli %arg1, %c8_i32 : i32
    %1 = tpu.assume_multiple %0, 8 : i32
    %cst = arith.constant 0.000000e+00 : f32
    %2 = vector.broadcast %cst : f32 to vector<128x128xf32>
    %c0_i32 = arith.constant 0 : i32
    %3 = arith.addi %1, %c0_i32 : i32
    %c0 = arith.constant 0 : index
    %4 = arith.index_cast %3 : i32 to index
    %c0_0 = arith.constant 0 : index
    %c0_1 = arith.constant 0 : index
    %5 = vector.load %arg2[%c0, %4, %c0_0, %c0_1] : memref<1x18x16x12xf32, #tpu.memory_space<vmem>>, vector<1x8x16x12xf32>
    %6 = vector.shape_cast %5 : vector<1x8x16x12xf32> to vector<8x16x12xf32>
    %7 = vector.shape_cast %6 : vector<8x16x12xf32> to vector<128x12xf32>
    %c0_2 = arith.constant 0 : index
    %c0_3 = arith.constant 0 : index
    %c0_4 = arith.constant 0 : index
    %8 = vector.load %arg3[%c0_2, %c0_3, %c0_4] : memref<3x12x128xf32, #tpu.memory_space<vmem>>, vector<1x12x128xf32>
    %9 = vector.shape_cast %8 : vector<1x12x128xf32> to vector<12x128xf32>
    %cst_5 = arith.constant dense<0.000000e+00> : vector<128x128xf32>
    %10 = tpu.matmul %7, %9, %cst_5 {dimension_numbers = #tpu.dot_dimension_numbers<[1], [0], [0], [1], [0, 0, 1, 1], [], []>} : vector<128x12xf32>, vector<12x128xf32>, vector<128x128xf32> -> vector<128x128xf32>
    %11 = arith.addf %2, %10 : vector<128x128xf32>
    %c1_i32 = arith.constant 1 : i32
    %12 = arith.addi %1, %c1_i32 : i32
    %c0_6 = arith.constant 0 : index
    %13 = arith.index_cast %12 : i32 to index
    %c0_7 = arith.constant 0 : index
    %c0_8 = arith.constant 0 : index
    %14 = vector.load %arg2[%c0_6, %13, %c0_7, %c0_8] : memref<1x18x16x12xf32, #tpu.memory_space<vmem>>, vector<1x8x16x12xf32>
    %15 = vector.shape_cast %14 : vector<1x8x16x12xf32> to vector<8x16x12xf32>
    %16 = vector.shape_cast %15 : vector<8x16x12xf32> to vector<128x12xf32>
    %c1 = arith.constant 1 : index
    %c0_9 = arith.constant 0 : index
    %c0_10 = arith.constant 0 : index
    %17 = vector.load %arg3[%c1, %c0_9, %c0_10] : memref<3x12x128xf32, #tpu.memory_space<vmem>>, vector<1x12x128xf32>
    %18 = vector.shape_cast %17 : vector<1x12x128xf32> to vector<12x128xf32>
    %cst_11 = arith.constant dense<0.000000e+00> : vector<128x128xf32>
    %19 = tpu.matmul %16, %18, %cst_11 {dimension_numbers = #tpu.dot_dimension_numbers<[1], [0], [0], [1], [0, 0, 1, 1], [], []>} : vector<128x12xf32>, vector<12x128xf32>, vector<128x128xf32> -> vector<128x128xf32>
    %20 = arith.addf %11, %19 : vector<128x128xf32>
    %c2_i32 = arith.constant 2 : i32
    %21 = arith.addi %1, %c2_i32 : i32
    %c0_12 = arith.constant 0 : index
    %22 = arith.index_cast %21 : i32 to index
    %c0_13 = arith.constant 0 : index
    %c0_14 = arith.constant 0 : index
    %23 = vector.load %arg2[%c0_12, %22, %c0_13, %c0_14] : memref<1x18x16x12xf32, #tpu.memory_space<vmem>>, vector<1x8x16x12xf32>
    %24 = vector.shape_cast %23 : vector<1x8x16x12xf32> to vector<8x16x12xf32>
    %25 = vector.shape_cast %24 : vector<8x16x12xf32> to vector<128x12xf32>
    %c2 = arith.constant 2 : index
    %c0_15 = arith.constant 0 : index
    %c0_16 = arith.constant 0 : index
    %26 = vector.load %arg3[%c2, %c0_15, %c0_16] : memref<3x12x128xf32, #tpu.memory_space<vmem>>, vector<1x12x128xf32>
    %27 = vector.shape_cast %26 : vector<1x12x128xf32> to vector<12x128xf32>
    %cst_17 = arith.constant dense<0.000000e+00> : vector<128x128xf32>
    %28 = tpu.matmul %25, %27, %cst_17 {dimension_numbers = #tpu.dot_dimension_numbers<[1], [0], [0], [1], [0, 0, 1, 1], [], []>} : vector<128x12xf32>, vector<12x128xf32>, vector<128x128xf32> -> vector<128x128xf32>
    %29 = arith.addf %20, %28 : vector<128x128xf32>
    %cst_18 = arith.constant 0.000000e+00 : f32
    %30 = vector.broadcast %cst_18 : f32 to vector<128x128xf32>
    %31 = arith.maximumf %29, %30 : vector<128x128xf32>
    %32 = vector.shape_cast %31 : vector<128x128xf32> to vector<8x16x128xf32>
    %c0_19 = arith.constant 0 : index
    %c0_20 = arith.constant 0 : index
    %c0_21 = arith.constant 0 : index
    %c0_22 = arith.constant 0 : index
    %33 = vector.load %arg4[%c0_19, %c0_20, %c0_21, %c0_22] : memref<1x8x16x128xf32, #tpu.memory_space<vmem>>, vector<1x8x16x128xf32>
    %34 = vector.shape_cast %33 : vector<1x8x16x128xf32> to vector<8x16x128xf32>
    %35 = vector.shape_cast %32 : vector<8x16x128xf32> to vector<1x8x16x128xf32>
    tpu.vector_store %arg4[%c0_19, %c0_20, %c0_21, %c0_22], %35 {strides = array<i32>} : memref<1x8x16x128xf32, #tpu.memory_space<vmem>>, vector<1x8x16x128xf32>,
    return
  }
  func.func @transform_0(%arg0: i32, %arg1: i32) -> (i32, i32, i32, i32) {
    %c0_i32 = arith.constant 0 : i32
    %c0_i32_0 = arith.constant 0 : i32
    %c0_i32_1 = arith.constant 0 : i32
    %c0_i32_2 = arith.constant 0 : i32
    return %arg0, %c0_i32, %c0_i32_0, %c0_i32_1 : i32, i32, i32, i32
  }
  func.func @transform_1(%arg0: i32, %arg1: i32) -> (i32, i32, i32) {
    %c0_i32 = arith.constant 0 : i32
    %c0_i32_0 = arith.constant 0 : i32
    %c0_i32_1 = arith.constant 0 : i32
    %c0_i32_2 = arith.constant 0 : i32
    return %c0_i32, %c0_i32_0, %c0_i32_1 : i32, i32, i32
  }
  func.func @transform_2(%arg0: i32, %arg1: i32) -> (i32, i32, i32, i32) {
    %c0_i32 = arith.constant 0 : i32
    %c0_i32_0 = arith.constant 0 : i32
    %c0_i32_1 = arith.constant 0 : i32
    return %arg0, %arg1, %c0_i32, %c0_i32_0 : i32, i32, i32, i32
  }
}

</mosaic_0001>

<bundles_post_ra>
// kernel: tpu_custom_call.1
= control target key start
LH: loop header
LB: loop body
LE: loop exit
PB: predicated region body
PF: predicated region fallthrough
CT: control target
= control target key end

     0   :  { %7 = vsyncpa [#allocation3], 0  ;;  %s1279_s0 = inlined_call_operand.vmem [shape: f32[2,18,16,12], index: 0, kind: input, shape index: {}]   ;;  %s1280_s1 = inlined_call_operand.vmem [shape: f32[3,12,128], index: 1, kind: input, shape index: {}]   ;;  %s1281_s2 = inlined_call_operand.hbm [shape: f32[2,16,16,128], index: 2, kind: output, shape index: {}]  }
   0x1   :  { %9 = vsyncpa [#allocation3 + $0x1], 0  ;;  %s1029_s9 = smov 0   ;;  %s1031_s10 = smov 0  }
   0x2   :  { %s1033_s11 = smov 0   ;;  %s1035_s12 = smov 0  }
   0x3   :  { %s1037_s13 = smov 0   ;;  %s1039_s14 = smov 0  }
   0x4   :  { %s1041_s15 = smov 0   ;;  %s1043_s16 = smov 0  }
   0x5 LB: > { %s725_s17 = sadd.s32 4294967295, %s1010_s16   ;;  %s726_s18 = sadd.s32 4294967294, %s1010_s16   ;;  %s1010_s16 = sphi %s1043_s16, %s15_s16   ;;  %s1006_s15 = sphi %s1041_s15, %s1290_s15   ;;  %s1002_s14 = sphi %s1039_s14, %s1289_s14   ;;  %s998_s13 = sphi %s1037_s13, %s1288_s13   ;;  %s994_s12 = sphi %s1035_s12, %s1287_s12   ;;  %s990_s11 = sphi %s1033_s11, %s1286_s11   ;;  %s986_s10 = sphi %s1031_s10, %s1285_s10   ;;  %s982_s9 = sphi %s1029_s9, %s1284_s9  }
   0x6   : > { %s24_s19 = sadd.s32 1, %s1002_s14  ;;  %s27_s20 = sadd.s32 1, %s1006_s15 }
   0x7   : > { %p25_p0 = scmp.ge.s32.totalorder %s24_s19, 2  ;;  %p93_p1 = scmp.ne.s32.totalorder %s990_s11, %s986_s10 }
   0x8   : > { %p94_p2 = scmp.eq.s32.totalorder %s725_s17, 3  ;;  %p99_p5 = scmp.ne.s32.totalorder %s986_s10, %s982_s9 }
   0x9   : > { %s1292_s19 = smov (%p25_p0, %s24_s19), 0  ;;  %s1294_s20 = smov (!%p25_p0, %s27_s20), %s1006_s15 }
   0xa   : > { %s79_s21 = ssub.s32 %s1002_s14, %s1292_s19  ;;  %p1080_p3 = por %p94_p2, %p93_p1 }
   0xb   : > { %p29_p4 = scmp.ge.s32.totalorder %s1294_s20, 2  ;;  %p100_p6 = scmp.eq.s32.totalorder %s726_s18, 3 }
   0xc   : > { %p729_p7 = scmp.ge.s32.totalorder %s1010_s16, 1  ;;  %p129_p9 = scmp.lt.s32.totalorder %s1010_s16, 5 }
   0xd   : > { %s1296_s20 = smov (%p29_p4, %s1294_s20), 0  ;;  %p1089_p8 = por %p100_p6, %p99_p5 }
   0xe   : > { %s78_s24 = ssub.s32 %s1006_s15, %s1296_s20  ;;  %s83_s25 = sadd.s32 1, %s990_s11 }
   0xf   : > { %s80_s26 = sor.u32 %s79_s21, %s78_s24  ;;  %p130_p10 = pnand %p729_p7, %p129_p9 }
  0x10   : > { %p81_p11 = scmp.eq.s32.totalorder %s80_s26, 0  ;;  %p151_p12 = scmp.lt.s32.totalorder (!%p130_p10), %s998_s13, 1 }
  0x11   : > { %133 = sbr.rel (%p130_p10) target bundleno = 259 (0x103), region = 28  ;;  %s832_s26 = sshll.u32 (!%p130_p10), %s994_s12, 7 }
  0x12   : > { %s1098_s27 = scalar_select %p81_p11, %s990_s11, %s83_s25  }
  0x13   : > { %s148_s4 = sand.u32 (!%p130_p10), 1, %s986_s10   ;;  %s835_s7 = sshll.u32 (!%p130_p10), %s994_s12, 4 }
  0x14   : > { %s730_s5 = sshll.u32 (!%p130_p10), %s148_s4, 7  ;;  %s828_s8 = sshll.u32 (!%p130_p10), %s998_s13, 5 }
  0x15   : > { %s1205_s6 = scalar_lea.vmem (!%p130_p10), [#allocation2], %s730_s5  ;;  %s633_s17 = sadd.s32 (!%p130_p10), %s835_s7, %s828_s8 }
  0x16   : > { %v753_v0 = vld [vmem:[%s1280_s1 + $0x18] sm:$0xf]  ;;  %vm249_vm0 = vcmask 1043456   ;;  %v807_v1 = vld [vmem:[%s1280_s1 + $0x28] sm:$0xf]  ;;  %v752_v2 = vld [vmem:[%s1280_s1 + $0x10] sm:$0xff] }
  0x17   : > { %836 = vmatpush.msk.msra.mxu3 %vm249_vm0, %v753_v0  ;;  %808 = vmatpush.msk.msra.mxu2 %vm249_vm0, %v807_v1  ;;  %v806_v3 = vld [vmem:[%s1280_s1 + $0x20] sm:$0xff]  ;;  %v177_v4 = vld [vmem:[%s1280_s1 + $0x8] sm:$0xf]  ;;  %s152_s24 = scalar_select %p151_p12, %s998_s13, 1  ;;  %vm200_vm1 = vcmask 97280  }
  0x18   : > { %754 = vmatpush.msk.msra.mxu0 %vm249_vm0, %v753_v0  ;;  %771 = vmatpush.msk.msra.mxu1 %vm249_vm0, %v177_v4  ;;  %v176_v5 = vld [vmem:[%s1280_s1] sm:$0xff]  ;;  %s829_s18 = sshll.u32 %s633_s17, 3  ;;  %s936_s5 = scalar_lea.hbm %s1281_s2, 512 }
  0x19   : > { %837 = vmatpush.msra.mxu3 %v752_v2  ;;  %522 = vmatpush.msra.mxu2 %v806_v3  ;;  %s842_s25 = smul.u32 288, %s152_s24  ;;  %s635_s21 = scalar_lea.hbm %s1281_s2, %s829_s18 }
  0x1a   : > { %268 = vmatpush.msra.mxu0 %v752_v2  ;;  %384 = vmatpush.msra.mxu1 %v176_v5  ;;  %s636_s24 = sshll.u32 %s1205_s6, 4  ;;  %s637_s24 = int_to_ptr.vmem [resolvable:$true] %s636_s24 }
  0x1b   : > { %838 = vmatpush.msk.msrb.mxu3 %vm249_vm0, %v177_v4  ;;  %s155_s30 = scalar_lea.vmem %s1279_s0, %s842_s25  ;;  %s638_s25 = sshll.u32 %s635_s21, 4  ;;  %s639_s25 = int_to_ptr.hbm [resolvable:$true] %s638_s25 }
  0x1c   : > { %s1129_s3 = scalar_lea.vmem %s155_s30, %s832_s26  ;;  %s621_s26 = scalar_lea.sflag [#allocation3], %s148_s4 }
  0x1d   : > { %839 = vmatpush.msrb.mxu3 %v176_v5  ;;  %v748_v6 = vld [vmem:[%s1129_s3 + $0x70] sm:$0xff]  ;;  %v790_v7 = vld [vmem:[%s1129_s3 + $0x20] sm:$0xff]  ;;  %v749_v10 = vld [vmem:[%s1129_s3 + $0x78] sm:$0xff]  ;;  %s930_s28 = sshra.s32 %s639_s25, 4  ;;  %s931_s28 = int_to_ptr.hbm [resolvable:$true] %s930_s28 }
  0x1e   : > { %v736_v8 = vld [vmem:[%s1129_s3 + $0x10] sm:$0xff]  ;;  %767 = vmatmul.msk.f32.vlgmr.msra.gmra.mxu3 %vm200_vm1, %v748_v6  ;;  %809 = vmatmul.msk.f32.vlgmr.msra.gmra.mxu2 %vm200_vm1, %v790_v7  ;;  %v160_v9 = vld [vmem:[%s1129_s3] sm:$0xff]  ;;  %v791_v11 = vld [vmem:[%s1129_s3 + $0x28] sm:$0xff]  ;;  %s932_s29 = scalar_lea.hbm %s931_s28, 128  ;;  %p937_p2 = scmp.lt.s32.totalorder %s931_s28, %s1281_s2 }
  0x1f   : > { %755 = vmatmul.msk.f32.vlgmr.msra.gmra.mxu0 %vm200_vm1, %v736_v8  ;;  %772 = vmatmul.msk.f32.vlgmr.msra.gmra.mxu1 %vm200_vm1, %v160_v9  ;;  %v737_v12 = vld [vmem:[%s1129_s3 + $0x18] sm:$0xff]  ;;  %v161_v13 = vld [vmem:[%s1129_s3 + $0x8] sm:$0xff]  ;;  %v750_v14 = vld [vmem:[%s1129_s3 + $0x80] sm:$0xff]  ;;  %p933_p13 = scmp.ne.s32.totalorder %s931_s28, %s932_s29  ;;  %p938_p4 = scmp.lt.s32.totalorder %s936_s5, %s932_s29 }
  0x20   : > { %840 = vmatpush.msk.msra.mxu3 %vm249_vm0, %v807_v1  ;;  %v792_v15 = vld [vmem:[%s1129_s3 + $0x30] sm:$0xff]  ;;  %v751_v16 = vld [vmem:[%s1129_s3 + $0x88] sm:$0xff]  ;;  %v793_v17 = vld [vmem:[%s1129_s3 + $0x38] sm:$0xff] }
  0x21   : > { %v172_v18 = vld [vmem:[%s1129_s3 + $0x60] sm:$0xff]  ;;  %v173_v20 = vld [vmem:[%s1129_s3 + $0x68] sm:$0xff]  ;;  %v796_v22 = vld [vmem:[%s1129_s3 + $0x50] sm:$0xff]  ;;  %p934_p0 = pnand %p933_p13, %p1080_p3  ;;  %p939_p5 = por %p938_p4, %p937_p2 }
  0x22   : > { %841 = vmatpush.msra.mxu3 %v806_v3  ;;  %v794_v19 = vld [vmem:[%s1129_s3 + $0x40] sm:$0xff]  ;;  %v795_v21 = vld [vmem:[%s1129_s3 + $0x48] sm:$0xff]  ;;  %v797_v23 = vld [vmem:[%s1129_s3 + $0x58] sm:$0xff] }
  0x23   : > { %v804_v24 = vld [vmem:[%s1129_s3 + $0x90] sm:$0xff]  ;;  %v805_v25 = vld [vmem:[%s1129_s3 + $0x98] sm:$0xff]  ;;  %p935_p1 = pneg %p934_p0 }
  0x25   : > { %p940_p6 = pnand %p939_p5, %p935_p1 }
  0x26   : > { %768 = vmatmul.msk.f32.gmra.mxu3 %vm200_vm1, %v749_v10  ;;  %810 = vmatmul.msk.f32.gmra.mxu2 %vm200_vm1, %v791_v11 }
  0x27   : > { %756 = vmatmul.msk.f32.gmra.mxu0 %vm200_vm1, %v737_v12  ;;  %773 = vmatmul.msk.f32.gmra.mxu1 %vm200_vm1, %v161_v13 }
  0x2e   : > { %769 = vmatmul.msk.f32.gmra.mxu3 %vm200_vm1, %v750_v14  ;;  %811 = vmatmul.msk.f32.gmra.mxu2 %vm200_vm1, %v792_v15 }
  0x2f   : > { %757 = vmatmul.msk.f32.gmra.mxu0 %vm200_vm1, %v790_v7  ;;  %774 = vmatmul.msk.f32.gmra.mxu1 %vm200_vm1, %v736_v8 }
  0x36   : > { %770 = vmatmul.msk.f32.gmra.mxu3 %vm200_vm1, %v751_v16  ;;  %812 = vmatmul.msk.f32.gmra.mxu2 %vm200_vm1, %v793_v17 }
  0x37   : > { %758 = vmatmul.msk.f32.gmra.mxu0 %vm200_vm1, %v791_v11  ;;  %775 = vmatmul.msk.f32.gmra.mxu1 %vm200_vm1, %v737_v12 }
  0x3e   : > { %784 = vmatmul.msk.f32.vlgmr.msrb.gmra.mxu3 %vm200_vm1, %v172_v18  ;;  %813 = vmatmul.msk.f32.gmra.mxu2 %vm200_vm1, %v794_v19 }
  0x3f   : > { %759 = vmatmul.msk.f32.gmra.mxu0 %vm200_vm1, %v792_v15  ;;  %776 = vmatmul.msk.f32.gmra.mxu1 %vm200_vm1, %v790_v7 }
  0x46   : > { %785 = vmatmul.msk.f32.gmra.mxu3 %vm200_vm1, %v173_v20  ;;  %814 = vmatmul.msk.f32.gmra.mxu2 %vm200_vm1, %v795_v21 }
  0x47   : > { %760 = vmatmul.msk.f32.gmra.mxu0 %vm200_vm1, %v793_v17  ;;  %777 = vmatmul.msk.f32.gmra.mxu1 %vm200_vm1, %v791_v11 }
  0x4e   : > { %786 = vmatmul.msk.f32.gmra.mxu3 %vm200_vm1, %v748_v6  ;;  %815 = vmatmul.msk.f32.gmra.mxu2 %vm200_vm1, %v796_v22 }
  0x4f   : > { %761 = vmatmul.msk.f32.gmra.mxu0 %vm200_vm1, %v794_v19  ;;  %778 = vmatmul.msk.f32.gmra.mxu1 %vm200_vm1, %v792_v15 }
  0x56   : > { %787 = vmatmul.msk.f32.gmra.mxu3 %vm200_vm1, %v749_v10  ;;  %816 = vmatmul.msk.f32.gmra.mxu2 %vm200_vm1, %v797_v23 }
  0x57   : > { %762 = vmatmul.msk.f32.gmra.mxu0 %vm200_vm1, %v795_v21  ;;  %779 = vmatmul.msk.f32.gmra.mxu1 %vm200_vm1, %v793_v17 }
  0x5e   : > { %817 = vmatmul.msk.f32.gmra.mxu2 %vm200_vm1, %v172_v18  ;;  %821 = vmatmul.msk.f32.vlgmr.msra.gmra.mxu3 %vm200_vm1, %v750_v14 }
  0x5f   : > { %763 = vmatmul.msk.f32.gmra.mxu0 %vm200_vm1, %v796_v22  ;;  %780 = vmatmul.msk.f32.gmra.mxu1 %vm200_vm1, %v794_v19 }
  0x66   : > { %818 = vmatmul.msk.f32.gmra.mxu2 %vm200_vm1, %v173_v20  ;;  %822 = vmatmul.msk.f32.gmra.mxu3 %vm200_vm1, %v751_v16 }
  0x67   : > { %764 = vmatmul.msk.f32.gmra.mxu0 %vm200_vm1, %v797_v23  ;;  %781 = vmatmul.msk.f32.gmra.mxu1 %vm200_vm1, %v795_v21 }
  0x6e   : > { %819 = vmatmul.msk.f32.gmra.mxu2 %vm200_vm1, %v748_v6  ;;  %823 = vmatmul.msk.f32.gmra.mxu3 %vm200_vm1, %v804_v24 }
  0x6f   : > { %765 = vmatmul.msk.f32.gmra.mxu0 %vm200_vm1, %v172_v18  ;;  %782 = vmatmul.msk.f32.gmra.mxu1 %vm200_vm1, %v796_v22 }
  0x76   : > { %820 = vmatmul.msk.f32.gmra.mxu2 %vm200_vm1, %v749_v10  ;;  %824 = vmatmul.msk.f32.gmra.mxu3 %vm200_vm1, %v805_v25 }
  0x77   : > { %766 = vmatmul.msk.f32.gmra.mxu0 %vm200_vm1, %v173_v20  ;;  %783 = vmatmul.msk.f32.gmra.mxu1 %vm200_vm1, %v797_v23 }
  0x9c   : > { %v270_v26 = vpop.f32.mrf.mxu0  ;;  %v386_v27 = vpop.f32.mrf.mxu1 }
  0x9d   : > { %v387_v28 = vadd.f32 %v386_v27, %v270_v26 }
  0xa1   : > { %v1203_v29 = vpop.f32.mrf.mxu3  ;;  %v524_v30 = vpop.f32.mrf.mxu2 }
  0xa2   : > { %v572_v31 = vadd.f32 %v524_v30, %v387_v28 }
  0xa4   : > { %v588_v32 = vmax.f32 %v572_v31, 0.0  ;;  %v273_v33 = vpop.f32.mrf.mxu0  ;;  %v389_v34 = vpop.f32.mrf.mxu1 }
  0xa5   : > { %v390_v35 = vadd.f32 %v389_v34, %v273_v33 }
  0xa6   : > { %604 = vst [vmem:[%s1205_s6] sm:$0xff] %v588_v32 }
  0xa9   : > { %v1208_v36 = vpop.f32.mrf.mxu3  ;;  %v527_v37 = vpop.f32.mrf.mxu2 }
  0xaa   : > { %v573_v38 = vadd.f32 %v527_v37, %v390_v35 }
  0xac   : > { %v589_v39 = vmax.f32 %v573_v38, 0.0  ;;  %v276_v40 = vpop.f32.mrf.mxu0  ;;  %v392_v41 = vpop.f32.mrf.mxu1 }
  0xad   : > { %v393_v42 = vadd.f32 %v392_v41, %v276_v40 }
  0xae   : > { %605 = vst [vmem:[%s1205_s6 + $0x8] sm:$0xff] %v589_v39 }
  0xb1   : > { %v1211_v43 = vpop.f32.mrf.mxu3  ;;  %v530_v44 = vpop.f32.mrf.mxu2 }
  0xb2   : > { %v574_v45 = vadd.f32 %v530_v44, %v393_v42 }
  0xb4   : > { %v590_v46 = vmax.f32 %v574_v45, 0.0  ;;  %v279_v47 = vpop.f32.mrf.mxu0  ;;  %v395_v48 = vpop.f32.mrf.mxu1 }
  0xb5   : > { %v396_v49 = vadd.f32 %v395_v48, %v279_v47 }
  0xb6   : > { %606 = vst [vmem:[%s1205_s6 + $0x10] sm:$0xff] %v590_v46 }
  0xb9   : > { %v1214_v50 = vpop.f32.mrf.mxu3  ;;  %v533_v51 = vpop.f32.mrf.mxu2 }
  0xba   : > { %v575_v52 = vadd.f32 %v533_v51, %v396_v49 }
  0xbc   : > { %v591_v53 = vmax.f32 %v575_v52, 0.0  ;;  %v282_v54 = vpop.f32.mrf.mxu0  ;;  %v398_v55 = vpop.f32.mrf.mxu1 }
  0xbd   : > { %v399_v56 = vadd.f32 %v398_v55, %v282_v54 }
  0xbe   : > { %607 = vst [vmem:[%s1205_s6 + $0x18] sm:$0xff] %v591_v53 }
  0xc1   : > { %v422_v57 = vpop.f32.mrf.mxu3  ;;  %v536_v58 = vpop.f32.mrf.mxu2 }
  0xc2   : > { %v576_v59 = vadd.f32 %v536_v58, %v399_v56  ;;  %v423_v21 = vadd.f32 %v422_v57, %v1203_v29 }
  0xc4   : > { %v592_v60 = vmax.f32 %v576_v59, 0.0  ;;  %v285_v61 = vpop.f32.mrf.mxu0  ;;  %v401_v62 = vpop.f32.mrf.mxu1 }
  0xc5   : > { %v402_v63 = vadd.f32 %v401_v62, %v285_v61 }
  0xc6   : > { %608 = vst [vmem:[%s1205_s6 + $0x20] sm:$0xff] %v592_v60 }
  0xc9   : > { %v425_v0 = vpop.f32.mrf.mxu3  ;;  %v539_v1 = vpop.f32.mrf.mxu2 }
  0xca   : > { %v577_v2 = vadd.f32 %v539_v1, %v402_v63  ;;  %v426_v32 = vadd.f32 %v425_v0, %v1208_v36 }
  0xcc   : > { %v593_v3 = vmax.f32 %v577_v2, 0.0  ;;  %v288_v4 = vpop.f32.mrf.mxu0  ;;  %v404_v5 = vpop.f32.mrf.mxu1 }
  0xcd   : > { %v405_v6 = vadd.f32 %v404_v5, %v288_v4 }
  0xce   : > { %609 = vst [vmem:[%s1205_s6 + $0x28] sm:$0xff] %v593_v3 }
  0xd1   : > { %v428_v7 = vpop.f32.mrf.mxu3  ;;  %v542_v8 = vpop.f32.mrf.mxu2 }
  0xd2   : > { %v578_v9 = vadd.f32 %v542_v8, %v405_v6  ;;  %v429_v42 = vadd.f32 %v428_v7, %v1211_v43 }
  0xd4   : > { %v594_v10 = vmax.f32 %v578_v9, 0.0  ;;  %v291_v11 = vpop.f32.mrf.mxu0  ;;  %v407_v12 = vpop.f32.mrf.mxu1 }
  0xd5   : > { %v408_v13 = vadd.f32 %v407_v12, %v291_v11 }
  0xd6   : > { %610 = vst [vmem:[%s1205_s6 + $0x30] sm:$0xff] %v594_v10 }
  0xd9   : > { %v431_v14 = vpop.f32.mrf.mxu3  ;;  %v545_v15 = vpop.f32.mrf.mxu2 }
  0xda   : > { %v579_v16 = vadd.f32 %v545_v15, %v408_v13  ;;  %v432_v43 = vadd.f32 %v431_v14, %v1214_v50 }
  0xdc   : > { %v595_v17 = vmax.f32 %v579_v16, 0.0  ;;  %v294_v18 = vpop.f32.mrf.mxu0  ;;  %v410_v19 = vpop.f32.mrf.mxu1 }
  0xdd   : > { %v411_v20 = vadd.f32 %v410_v19, %v294_v18 }
  0xde   : > { %611 = vst [vmem:[%s1205_s6 + $0x38] sm:$0xff] %v595_v17 }
  0xe1   : > { %v548_v22 = vpop.f32.mrf.mxu2  ;;  %v560_v23 = vpop.f32.mrf.mxu3 }
  0xe2   : > { %v580_v24 = vadd.f32 %v548_v22, %v411_v20  ;;  %v584_v25 = vadd.f32 %v560_v23, %v423_v21 }
  0xe4   : > { %v596_v26 = vmax.f32 %v580_v24, 0.0  ;;  %v600_v27 = vmax.f32 %v584_v25, 0.0  ;;  %v297_v28 = vpop.f32.mrf.mxu0  ;;  %v413_v30 = vpop.f32.mrf.mxu1 }
  0xe5   : > { %v414_v31 = vadd.f32 %v413_v30, %v297_v28 }
  0xe6   : > { %612 = vst [vmem:[%s1205_s6 + $0x40] sm:$0xff] %v596_v26 }
  0xe7   : > { %616 = vst [vmem:[%s1205_s6 + $0x60] sm:$0xff] %v600_v27 }
  0xe9   : > { %v551_v33 = vpop.f32.mrf.mxu2  ;;  %v563_v34 = vpop.f32.mrf.mxu3 }
  0xea   : > { %v581_v29 = vadd.f32 %v551_v33, %v414_v31  ;;  %v585_v35 = vadd.f32 %v563_v34, %v426_v32 }
  0xec   : > { %v597_v37 = vmax.f32 %v581_v29, 0.0  ;;  %v601_v38 = vmax.f32 %v585_v35, 0.0  ;;  %v300_v39 = vpop.f32.mrf.mxu0  ;;  %v416_v40 = vpop.f32.mrf.mxu1 }
  0xed   : > { %v417_v41 = vadd.f32 %v416_v40, %v300_v39 }
  0xee   : > { %613 = vst [vmem:[%s1205_s6 + $0x48] sm:$0xff] %v597_v37 }
  0xef   : > { %617 = vst [vmem:[%s1205_s6 + $0x68] sm:$0xff] %v601_v38 }
  0xf1   : > { %v554_v44 = vpop.f32.mrf.mxu2  ;;  %v566_v36 = vpop.f32.mrf.mxu3 }
  0xf2   : > { %v582_v45 = vadd.f32 %v554_v44, %v417_v41  ;;  %v586_v46 = vadd.f32 %v566_v36, %v429_v42 }
  0xf4   : > { %v598_v47 = vmax.f32 %v582_v45, 0.0  ;;  %v602_v48 = vmax.f32 %v586_v46, 0.0  ;;  %v303_v49 = vpop.f32.mrf.mxu0  ;;  %v419_v51 = vpop.f32.mrf.mxu1 }
  0xf5   : > { %v420_v52 = vadd.f32 %v419_v51, %v303_v49 }
  0xf6   : > { %614 = vst [vmem:[%s1205_s6 + $0x50] sm:$0xff] %v598_v47 }
  0xf7   : > { %618 = vst [vmem:[%s1205_s6 + $0x70] sm:$0xff] %v602_v48 }
  0xf9   : > { %v557_v53 = vpop.f32.mrf.mxu2  ;;  %v569_v54 = vpop.f32.mrf.mxu3 }
  0xfa   : > { %v583_v55 = vadd.f32 %v557_v53, %v420_v52  ;;  %v587_v56 = vadd.f32 %v569_v54, %v432_v43 }
  0xfc   : > { %v599_v57 = vmax.f32 %v583_v55, 0.0  ;;  %v603_v58 = vmax.f32 %v587_v56, 0.0 }
  0xfe   : > { %615 = vst [vmem:[%s1205_s6 + $0x58] sm:$0xff] %v599_v57 }
  0xff   : > { %619 = vst [vmem:[%s1205_s6 + $0x78] sm:$0xff] %v603_v58 }
 0x100   : > { %943 = shalt.err (!%p940_p6)
}
 0x101   : > { %s1012_s4 = smov 128   ;;  %s1013_s6 = smov 8  }
 0x102   : > { %843 = dma.vmem_to_hbm [thread:$0]  (%p1080_p3), %s637_s24, 2048, %s639_s25, %s621_s26, %s1012_s4, %s1012_s4, %s1013_s6  }
 0x103 PF: > { %p849_p7 = scmp.ge.s32.totalorder %s1010_s16, 2  ;;  %s653_s17 = sand.u32 1, %s982_s9  }
 0x104   : > { %s654_s18 = scalar_lea.sflag [#allocation3], %s653_s17 }
 0x105   : > { %p846_p9 = pnand %p849_p7, %p1089_p8 }
 0x107   : > { %p847_p10 = pneg %p846_p9 }
 0x109   : > { %977 = dma.done.wait (%p847_p10), %s654_s18, 2048  }
 0x10a   : > { %979 = vsyncadd (%p847_p10), %s654_s18, 4294965248  ;;  %s15_s16 = sadd.s32 1, %s1010_s16   ;;  %s1284_s9 = smov %s986_s10 }
 0x10b   : > { %p12_p11 = scmp.ge.s32.totalorder %s15_s16, 6   ;;  %s1285_s10 = smov %s990_s11 }
 0x10c   : > { %s1286_s11 = smov %s1098_s27  ;;  %s1287_s12 = smov %s1002_s14 }
 0x10d   : > { %s1288_s13 = smov %s1006_s15  ;;  %s1289_s14 = smov %s1292_s19 }
 0x10e   : > { %s1290_s15 = smov %s1296_s20  ;;  %14 = sbr.rel (!%p12_p11) target bundleno = 5 (0x5), region = 68 }
 0x113   :  { %660 = vsyncpa [#allocation3], 1 }
 0x114   :  { %662 = vsyncpa [#allocation3 + $0x1], 1 }

</bundles_post_ra>
